<compile_context>
chip_gen: v5e
topology: v5e:2x2
jax: 0.10.0
libtpu: 0.0.40
codegen_flags: <defaults>
</compile_context>

<pallas_src>
import jax
import jax.numpy as jnp
from jax import lax
from jax.experimental import pallas as pl
from jax.experimental.pallas import tpu as pltpu


def _rnn_kernel(ids_ref, h0_ref, wih_t_ref, whh_t_ref, b_ref, wout_t_ref, bout_ref,
                out_ref, hN_ref, y_scratch):
    # ids_ref: (seq, batch) int32 token ids in SMEM (scalar-prefetched).
    seq, batch = ids_ref.shape

    # Hoisted loop invariants (JAX does not CSE broadcasts inside the loop).
    whh_t = whh_t_ref[...]            # (H, H)
    bias = b_ref[...]                 # (1, H) = b_ih + b_hh

    def step(t, h_prev):
        # Embedding-style gather: one-hot(x_t) @ W_ih^T == W_ih^T[token_id].
        rows = [wih_t_ref[pl.ds(ids_ref[t, b], 1), :] for b in range(batch)]
        xw = jnp.concatenate(rows, axis=0)                        # (B, H)

        # h_t = tanh(x_t W_ih^T + b_ih + h_{t-1} W_hh^T + b_hh)
        h_new = jnp.tanh(
            xw
            + jnp.dot(h_prev, whh_t, preferred_element_type=jnp.float32)
            + bias
        )

        # Stash h_t rows seq-major, matching Y.reshape(-1, H) ordering.
        y_scratch[pl.ds(t * batch, batch), :] = h_new
        return h_new

    h_final = lax.fori_loop(0, seq, step, h0_ref[0], unroll=True)
    hN_ref[0] = h_final               # final state (num_layers*num_dirs = 1)

    # One batched output head: (S*B, H) @ (H, V) + b_out, written once.
    out_ref[...] = (
        jnp.dot(y_scratch[...], wout_t_ref[...], preferred_element_type=jnp.float32)
        + bout_ref[...]
    )


def rnn_model_forward(inputs, state, params, vocab_size):
    """inputs: (batch, seq) int32 token ids; state: (1, batch, hidden) float32."""
    w_ih, w_hh, b_ih, b_hh, w_out, b_out = params
    hidden = w_hh.shape[0]
    batch, seq = inputs.shape

    ids = inputs.T.astype(jnp.int32)                    # (seq, batch) -> SMEM
    wih_t = jnp.asarray(w_ih.T, jnp.float32)            # (V, H) embedding table
    whh_t = jnp.asarray(w_hh.T, jnp.float32)            # (H, H)
    b_comb = (b_ih + b_hh).reshape(1, hidden).astype(jnp.float32)
    wout_t = jnp.asarray(w_out.T, jnp.float32)          # (H, V)
    bout = b_out.reshape(1, vocab_size).astype(jnp.float32)

    out_shapes = (
        jax.ShapeDtypeStruct((seq * batch, vocab_size), jnp.float32),  # logits
        jax.ShapeDtypeStruct((1, batch, hidden), jnp.float32),         # final state
    )

    grid_spec = pltpu.PrefetchScalarGridSpec(
        num_scalar_prefetch=1,                 # token ids -> SMEM
        grid=(1,),                             # whole recurrence in one invocation
        in_specs=[
            pl.BlockSpec((1, batch, hidden), lambda i, ids: (0, 0, 0)),   # h0
            pl.BlockSpec((vocab_size, hidden), lambda i, ids: (0, 0)),    # W_ih^T
            pl.BlockSpec((hidden, hidden), lambda i, ids: (0, 0)),        # W_hh^T
            pl.BlockSpec((1, hidden), lambda i, ids: (0, 0)),             # b_ih+b_hh
            pl.BlockSpec((hidden, vocab_size), lambda i, ids: (0, 0)),    # W_out^T
            pl.BlockSpec((1, vocab_size), lambda i, ids: (0, 0)),         # b_out
        ],
        out_specs=[
            pl.BlockSpec((seq * batch, vocab_size), lambda i, ids: (0, 0)),
            pl.BlockSpec((1, batch, hidden), lambda i, ids: (0, 0, 0)),
        ],
        scratch_shapes=[pltpu.VMEM((seq * batch, hidden), jnp.float32)],
    )

    logits, h_final = pl.pallas_call(
        _rnn_kernel,
        out_shape=out_shapes,
        grid_spec=grid_spec,
        compiler_params=pltpu.CompilerParams(
            dimension_semantics=("arbitrary",),   # single sequential invocation
        ),
    )(ids, state, wih_t, whh_t, b_comb, wout_t, bout)

    # output == linear(Y.reshape((-1, H))) -> (seq*batch, vocab)
    return logits, h_final


def _reference_forward(inputs, state, params, vocab_size):
    """Pure-JAX reference of the PyTorch forward, for correctness checking."""
    w_ih, w_hh, b_ih, b_hh, w_out, b_out = params
    X = jax.nn.one_hot(inputs.T, vocab_size, dtype=jnp.float32)   # (seq, batch, vocab)
    h0 = state[0]

    def step(h, x_t):
        h_new = jnp.tanh(x_t @ w_ih.T + b_ih + h @ w_hh.T + b_hh)
        return h_new, h_new

    h_last, Y = jax.lax.scan(step, h0, X)
    out = Y.reshape(-1, Y.shape[-1]) @ w_out.T + b_out
    return out, h_last[None]


if __name__ == "__main__":
    batch, seq, vocab, hidden = 2, 8, 32, 32

    key = jax.random.PRNGKey(0)
    k_in, k_wih, k_whh, k_bih, k_bhh, k_wo, k_bo = jax.random.split(key, 7)

    # Deterministic parameter init (PyTorch nn.RNN default: U(-1/sqrt(H), 1/sqrt(H))).
    s = 1.0 / jnp.sqrt(hidden)
    w_ih = jax.random.uniform(k_wih, (hidden, vocab), jnp.float32, -s, s)
    w_hh = jax.random.uniform(k_whh, (hidden, hidden), jnp.float32, -s, s)
    b_ih = jax.random.uniform(k_bih, (hidden,), jnp.float32, -s, s)
    b_hh = jax.random.uniform(k_bhh, (hidden,), jnp.float32, -s, s)
    w_out = jax.random.uniform(k_wo, (vocab, hidden), jnp.float32, -s, s)
    b_out = jax.random.uniform(k_bo, (vocab,), jnp.float32, -s, s)
    params = (w_ih, w_hh, b_ih, b_hh, w_out, b_out)

    # Example token ids (batch, seq) and begin_state().
    inputs = jax.random.randint(k_in, (batch, seq), 0, vocab, dtype=jnp.int32)
    state = jnp.zeros((1, batch, hidden), jnp.float32)

    output, new_state = rnn_model_forward(inputs, state, params, vocab)
    output = jax.block_until_ready(output)
    new_state = jax.block_until_ready(new_state)

    ref_out, ref_state = _reference_forward(inputs, state, params, vocab)
    assert output.shape == (seq * batch, vocab)
    assert new_state.shape == (1, batch, hidden)
    assert jnp.allclose(output, ref_out, atol=1e-5, rtol=1e-5)
    assert jnp.allclose(new_state, ref_state, atol=1e-5, rtol=1e-5)

    print("KERNEL_OK")
</pallas_src>

<mosaic_0001>
module attributes {stable_mosaic.version = 11 : i64} {
  func.func @_rnn_kernel(%arg0: i32, %arg1: memref<8x2xi32, #tpu.memory_space<smem>>, %arg2: memref<1x2x32xf32, #tpu.memory_space<vmem>>, %arg3: memref<32x32xf32, #tpu.memory_space<vmem>>, %arg4: memref<32x32xf32, #tpu.memory_space<vmem>>, %arg5: memref<1x32xf32, #tpu.memory_space<vmem>>, %arg6: memref<32x32xf32, #tpu.memory_space<vmem>>, %arg7: memref<1x32xf32, #tpu.memory_space<vmem>>, %arg8: memref<16x32xf32, #tpu.memory_space<vmem>>, %arg9: memref<1x2x32xf32, #tpu.memory_space<vmem>>, %arg10: memref<16x32xf32, #tpu.memory_space<vmem>>) attributes {dimension_semantics = [#tpu.dimension_semantics<arbitrary>], iteration_bounds = array<i64: 1>, scalar_prefetch = 1 : i64, scratch_operands = 1 : i64, tpu.core_type = #tpu.core_type<tc>, window_params = [{pipeline_mode = #tpu.pipeline_mode<synchronous>, transform_indices = @transform_0, window_bounds = array<i64: 1, 2, 32>}, {pipeline_mode = #tpu.pipeline_mode<synchronous>, transform_indices = @transform_1, window_bounds = array<i64: 32, 32>}, {pipeline_mode = #tpu.pipeline_mode<synchronous>, transform_indices = @transform_2, window_bounds = array<i64: 32, 32>}, {pipeline_mode = #tpu.pipeline_mode<synchronous>, transform_indices = @transform_3, window_bounds = array<i64: 1, 32>}, {pipeline_mode = #tpu.pipeline_mode<synchronous>, transform_indices = @transform_4, window_bounds = array<i64: 32, 32>}, {pipeline_mode = #tpu.pipeline_mode<synchronous>, transform_indices = @transform_5, window_bounds = array<i64: 1, 32>}, {pipeline_mode = #tpu.pipeline_mode<synchronous>, transform_indices = @transform_6, window_bounds = array<i64: 16, 32>}, {pipeline_mode = #tpu.pipeline_mode<synchronous>, transform_indices = @transform_7, window_bounds = array<i64: 1, 2, 32>}]} {
    %c0 = arith.constant 0 : index
    %c0_0 = arith.constant 0 : index
    %0 = vector.load %arg4[%c0, %c0_0] : memref<32x32xf32, #tpu.memory_space<vmem>>, vector<32x32xf32>
    %c0_1 = arith.constant 0 : index
    %c0_2 = arith.constant 0 : index
    %1 = vector.load %arg5[%c0_1, %c0_2] : memref<1x32xf32, #tpu.memory_space<vmem>>, vector<1x32xf32>
    %c0_3 = arith.constant 0 : index
    %c0_4 = arith.constant 0 : index
    %c0_5 = arith.constant 0 : index
    %2 = vector.load %arg2[%c0_3, %c0_4, %c0_5] : memref<1x2x32xf32, #tpu.memory_space<vmem>>, vector<1x2x32xf32>
    %3 = vector.shape_cast %2 : vector<1x2x32xf32> to vector<2x32xf32>
    %c0_i32 = arith.constant 0 : i32
    %4 = arith.index_cast %c0_i32 : i32 to index
    %c0_6 = arith.constant 0 : index
    %5 = memref.load %arg1[%4, %c0_6] : memref<8x2xi32, #tpu.memory_space<smem>>
    %6 = arith.index_cast %5 : i32 to index
    %c0_7 = arith.constant 0 : index
    %7 = vector.load %arg3[%6, %c0_7] : memref<32x32xf32, #tpu.memory_space<vmem>>, vector<1x32xf32>
    %8 = arith.index_cast %c0_i32 : i32 to index
    %c1 = arith.constant 1 : index
    %9 = memref.load %arg1[%8, %c1] : memref<8x2xi32, #tpu.memory_space<smem>>
    %10 = arith.index_cast %9 : i32 to index
    %c0_8 = arith.constant 0 : index
    %11 = vector.load %arg3[%10, %c0_8] : memref<32x32xf32, #tpu.memory_space<vmem>>, vector<1x32xf32>
    %12 = tpu.concatenate %7, %11 in 0 : vector<1x32xf32>, vector<1x32xf32> -> vector<2x32xf32>
    %cst = arith.constant dense<0.000000e+00> : vector<2x32xf32>
    %13 = tpu.matmul %3, %0, %cst {dimension_numbers = #tpu.dot_dimension_numbers<[1], [0], [0], [1], [0, 0, 1, 1], [], []>} : vector<2x32xf32>, vector<32x32xf32>, vector<2x32xf32> -> vector<2x32xf32>
    %14 = arith.addf %12, %13 : vector<2x32xf32>
    %15 = vector.broadcast %1 : vector<1x32xf32> to vector<2x32xf32>
    %16 = arith.addf %14, %15 : vector<2x32xf32>
    %17 = math.tanh %16 : vector<2x32xf32>
    %c2_i32 = arith.constant 2 : i32
    %18 = arith.muli %c0_i32, %c2_i32 : i32
    %19 = arith.index_cast %18 : i32 to index
    %c0_9 = arith.constant 0 : index
    %20 = vector.load %arg10[%19, %c0_9] : memref<16x32xf32, #tpu.memory_space<vmem>>, vector<2x32xf32>
    tpu.vector_store %arg10[%19, %c0_9], %17 {strides = array<i32>} : memref<16x32xf32, #tpu.memory_space<vmem>>, vector<2x32xf32>,
    %c1_i32 = arith.constant 1 : i32
    %21 = arith.index_cast %c1_i32 : i32 to index
    %c0_10 = arith.constant 0 : index
    %22 = memref.load %arg1[%21, %c0_10] : memref<8x2xi32, #tpu.memory_space<smem>>
    %23 = arith.index_cast %22 : i32 to index
    %c0_11 = arith.constant 0 : index
    %24 = vector.load %arg3[%23, %c0_11] : memref<32x32xf32, #tpu.memory_space<vmem>>, vector<1x32xf32>
    %25 = arith.index_cast %c1_i32 : i32 to index
    %c1_12 = arith.constant 1 : index
    %26 = memref.load %arg1[%25, %c1_12] : memref<8x2xi32, #tpu.memory_space<smem>>
    %27 = arith.index_cast %26 : i32 to index
    %c0_13 = arith.constant 0 : index
    %28 = vector.load %arg3[%27, %c0_13] : memref<32x32xf32, #tpu.memory_space<vmem>>, vector<1x32xf32>
    %29 = tpu.concatenate %24, %28 in 0 : vector<1x32xf32>, vector<1x32xf32> -> vector<2x32xf32>
    %cst_14 = arith.constant dense<0.000000e+00> : vector<2x32xf32>
    %30 = tpu.matmul %17, %0, %cst_14 {dimension_numbers = #tpu.dot_dimension_numbers<[1], [0], [0], [1], [0, 0, 1, 1], [], []>} : vector<2x32xf32>, vector<32x32xf32>, vector<2x32xf32> -> vector<2x32xf32>
    %31 = arith.addf %29, %30 : vector<2x32xf32>
    %32 = vector.broadcast %1 : vector<1x32xf32> to vector<2x32xf32>
    %33 = arith.addf %31, %32 : vector<2x32xf32>
    %34 = math.tanh %33 : vector<2x32xf32>
    %c2_i32_15 = arith.constant 2 : i32
    %35 = arith.muli %c1_i32, %c2_i32_15 : i32
    %36 = arith.index_cast %35 : i32 to index
    %c0_16 = arith.constant 0 : index
    %37 = vector.load %arg10[%36, %c0_16] : memref<16x32xf32, #tpu.memory_space<vmem>>, vector<2x32xf32>
    tpu.vector_store %arg10[%36, %c0_16], %34 {strides = array<i32>} : memref<16x32xf32, #tpu.memory_space<vmem>>, vector<2x32xf32>,
    %c2_i32_17 = arith.constant 2 : i32
    %38 = arith.index_cast %c2_i32_17 : i32 to index
    %c0_18 = arith.constant 0 : index
    %39 = memref.load %arg1[%38, %c0_18] : memref<8x2xi32, #tpu.memory_space<smem>>
    %40 = arith.index_cast %39 : i32 to index
    %c0_19 = arith.constant 0 : index
    %41 = vector.load %arg3[%40, %c0_19] : memref<32x32xf32, #tpu.memory_space<vmem>>, vector<1x32xf32>
    %42 = arith.index_cast %c2_i32_17 : i32 to index
    %c1_20 = arith.constant 1 : index
    %43 = memref.load %arg1[%42, %c1_20] : memref<8x2xi32, #tpu.memory_space<smem>>
    %44 = arith.index_cast %43 : i32 to index
    %c0_21 = arith.constant 0 : index
    %45 = vector.load %arg3[%44, %c0_21] : memref<32x32xf32, #tpu.memory_space<vmem>>, vector<1x32xf32>
    %46 = tpu.concatenate %41, %45 in 0 : vector<1x32xf32>, vector<1x32xf32> -> vector<2x32xf32>
    %cst_22 = arith.constant dense<0.000000e+00> : vector<2x32xf32>
    %47 = tpu.matmul %34, %0, %cst_22 {dimension_numbers = #tpu.dot_dimension_numbers<[1], [0], [0], [1], [0, 0, 1, 1], [], []>} : vector<2x32xf32>, vector<32x32xf32>, vector<2x32xf32> -> vector<2x32xf32>
    %48 = arith.addf %46, %47 : vector<2x32xf32>
    %49 = vector.broadcast %1 : vector<1x32xf32> to vector<2x32xf32>
    %50 = arith.addf %48, %49 : vector<2x32xf32>
    %51 = math.tanh %50 : vector<2x32xf32>
    %c2_i32_23 = arith.constant 2 : i32
    %52 = arith.muli %c2_i32_17, %c2_i32_23 : i32
    %53 = arith.index_cast %52 : i32 to index
    %c0_24 = arith.constant 0 : index
    %54 = vector.load %arg10[%53, %c0_24] : memref<16x32xf32, #tpu.memory_space<vmem>>, vector<2x32xf32>
    tpu.vector_store %arg10[%53, %c0_24], %51 {strides = array<i32>} : memref<16x32xf32, #tpu.memory_space<vmem>>, vector<2x32xf32>,
    %c3_i32 = arith.constant 3 : i32
    %55 = arith.index_cast %c3_i32 : i32 to index
    %c0_25 = arith.constant 0 : index
    %56 = memref.load %arg1[%55, %c0_25] : memref<8x2xi32, #tpu.memory_space<smem>>
    %57 = arith.index_cast %56 : i32 to index
    %c0_26 = arith.constant 0 : index
    %58 = vector.load %arg3[%57, %c0_26] : memref<32x32xf32, #tpu.memory_space<vmem>>, vector<1x32xf32>
    %59 = arith.index_cast %c3_i32 : i32 to index
    %c1_27 = arith.constant 1 : index
    %60 = memref.load %arg1[%59, %c1_27] : memref<8x2xi32, #tpu.memory_space<smem>>
    %61 = arith.index_cast %60 : i32 to index
    %c0_28 = arith.constant 0 : index
    %62 = vector.load %arg3[%61, %c0_28] : memref<32x32xf32, #tpu.memory_space<vmem>>, vector<1x32xf32>
    %63 = tpu.concatenate %58, %62 in 0 : vector<1x32xf32>, vector<1x32xf32> -> vector<2x32xf32>
    %cst_29 = arith.constant dense<0.000000e+00> : vector<2x32xf32>
    %64 = tpu.matmul %51, %0, %cst_29 {dimension_numbers = #tpu.dot_dimension_numbers<[1], [0], [0], [1], [0, 0, 1, 1], [], []>} : vector<2x32xf32>, vector<32x32xf32>, vector<2x32xf32> -> vector<2x32xf32>
    %65 = arith.addf %63, %64 : vector<2x32xf32>
    %66 = vector.broadcast %1 : vector<1x32xf32> to vector<2x32xf32>
    %67 = arith.addf %65, %66 : vector<2x32xf32>
    %68 = math.tanh %67 : vector<2x32xf32>
    %c2_i32_30 = arith.constant 2 : i32
    %69 = arith.muli %c3_i32, %c2_i32_30 : i32
    %70 = arith.index_cast %69 : i32 to index
    %c0_31 = arith.constant 0 : index
    %71 = vector.load %arg10[%70, %c0_31] : memref<16x32xf32, #tpu.memory_space<vmem>>, vector<2x32xf32>
    tpu.vector_store %arg10[%70, %c0_31], %68 {strides = array<i32>} : memref<16x32xf32, #tpu.memory_space<vmem>>, vector<2x32xf32>,
    %c4_i32 = arith.constant 4 : i32
    %72 = arith.index_cast %c4_i32 : i32 to index
    %c0_32 = arith.constant 0 : index
    %73 = memref.load %arg1[%72, %c0_32] : memref<8x2xi32, #tpu.memory_space<smem>>
    %74 = arith.index_cast %73 : i32 to index
    %c0_33 = arith.constant 0 : index
    %75 = vector.load %arg3[%74, %c0_33] : memref<32x32xf32, #tpu.memory_space<vmem>>, vector<1x32xf32>
    %76 = arith.index_cast %c4_i32 : i32 to index
    %c1_34 = arith.constant 1 : index
    %77 = memref.load %arg1[%76, %c1_34] : memref<8x2xi32, #tpu.memory_space<smem>>
    %78 = arith.index_cast %77 : i32 to index
    %c0_35 = arith.constant 0 : index
    %79 = vector.load %arg3[%78, %c0_35] : memref<32x32xf32, #tpu.memory_space<vmem>>, vector<1x32xf32>
    %80 = tpu.concatenate %75, %79 in 0 : vector<1x32xf32>, vector<1x32xf32> -> vector<2x32xf32>
    %cst_36 = arith.constant dense<0.000000e+00> : vector<2x32xf32>
    %81 = tpu.matmul %68, %0, %cst_36 {dimension_numbers = #tpu.dot_dimension_numbers<[1], [0], [0], [1], [0, 0, 1, 1], [], []>} : vector<2x32xf32>, vector<32x32xf32>, vector<2x32xf32> -> vector<2x32xf32>
    %82 = arith.addf %80, %81 : vector<2x32xf32>
    %83 = vector.broadcast %1 : vector<1x32xf32> to vector<2x32xf32>
    %84 = arith.addf %82, %83 : vector<2x32xf32>
    %85 = math.tanh %84 : vector<2x32xf32>
    %c2_i32_37 = arith.constant 2 : i32
    %86 = arith.muli %c4_i32, %c2_i32_37 : i32
    %87 = arith.index_cast %86 : i32 to index
    %c0_38 = arith.constant 0 : index
    %88 = vector.load %arg10[%87, %c0_38] : memref<16x32xf32, #tpu.memory_space<vmem>>, vector<2x32xf32>
    tpu.vector_store %arg10[%87, %c0_38], %85 {strides = array<i32>} : memref<16x32xf32, #tpu.memory_space<vmem>>, vector<2x32xf32>,
    %c5_i32 = arith.constant 5 : i32
    %89 = arith.index_cast %c5_i32 : i32 to index
    %c0_39 = arith.constant 0 : index
    %90 = memref.load %arg1[%89, %c0_39] : memref<8x2xi32, #tpu.memory_space<smem>>
    %91 = arith.index_cast %90 : i32 to index
    %c0_40 = arith.constant 0 : index
    %92 = vector.load %arg3[%91, %c0_40] : memref<32x32xf32, #tpu.memory_space<vmem>>, vector<1x32xf32>
    %93 = arith.index_cast %c5_i32 : i32 to index
    %c1_41 = arith.constant 1 : index
    %94 = memref.load %arg1[%93, %c1_41] : memref<8x2xi32, #tpu.memory_space<smem>>
    %95 = arith.index_cast %94 : i32 to index
    %c0_42 = arith.constant 0 : index
    %96 = vector.load %arg3[%95, %c0_42] : memref<32x32xf32, #tpu.memory_space<vmem>>, vector<1x32xf32>
    %97 = tpu.concatenate %92, %96 in 0 : vector<1x32xf32>, vector<1x32xf32> -> vector<2x32xf32>
    %cst_43 = arith.constant dense<0.000000e+00> : vector<2x32xf32>
    %98 = tpu.matmul %85, %0, %cst_43 {dimension_numbers = #tpu.dot_dimension_numbers<[1], [0], [0], [1], [0, 0, 1, 1], [], []>} : vector<2x32xf32>, vector<32x32xf32>, vector<2x32xf32> -> vector<2x32xf32>
    %99 = arith.addf %97, %98 : vector<2x32xf32>
    %100 = vector.broadcast %1 : vector<1x32xf32> to vector<2x32xf32>
    %101 = arith.addf %99, %100 : vector<2x32xf32>
    %102 = math.tanh %101 : vector<2x32xf32>
    %c2_i32_44 = arith.constant 2 : i32
    %103 = arith.muli %c5_i32, %c2_i32_44 : i32
    %104 = arith.index_cast %103 : i32 to index
    %c0_45 = arith.constant 0 : index
    %105 = vector.load %arg10[%104, %c0_45] : memref<16x32xf32, #tpu.memory_space<vmem>>, vector<2x32xf32>
    tpu.vector_store %arg10[%104, %c0_45], %102 {strides = array<i32>} : memref<16x32xf32, #tpu.memory_space<vmem>>, vector<2x32xf32>,
    %c6_i32 = arith.constant 6 : i32
    %106 = arith.index_cast %c6_i32 : i32 to index
    %c0_46 = arith.constant 0 : index
    %107 = memref.load %arg1[%106, %c0_46] : memref<8x2xi32, #tpu.memory_space<smem>>
    %108 = arith.index_cast %107 : i32 to index
    %c0_47 = arith.constant 0 : index
    %109 = vector.load %arg3[%108, %c0_47] : memref<32x32xf32, #tpu.memory_space<vmem>>, vector<1x32xf32>
    %110 = arith.index_cast %c6_i32 : i32 to index
    %c1_48 = arith.constant 1 : index
    %111 = memref.load %arg1[%110, %c1_48] : memref<8x2xi32, #tpu.memory_space<smem>>
    %112 = arith.index_cast %111 : i32 to index
    %c0_49 = arith.constant 0 : index
    %113 = vector.load %arg3[%112, %c0_49] : memref<32x32xf32, #tpu.memory_space<vmem>>, vector<1x32xf32>
    %114 = tpu.concatenate %109, %113 in 0 : vector<1x32xf32>, vector<1x32xf32> -> vector<2x32xf32>
    %cst_50 = arith.constant dense<0.000000e+00> : vector<2x32xf32>
    %115 = tpu.matmul %102, %0, %cst_50 {dimension_numbers = #tpu.dot_dimension_numbers<[1], [0], [0], [1], [0, 0, 1, 1], [], []>} : vector<2x32xf32>, vector<32x32xf32>, vector<2x32xf32> -> vector<2x32xf32>
    %116 = arith.addf %114, %115 : vector<2x32xf32>
    %117 = vector.broadcast %1 : vector<1x32xf32> to vector<2x32xf32>
    %118 = arith.addf %116, %117 : vector<2x32xf32>
    %119 = math.tanh %118 : vector<2x32xf32>
    %c2_i32_51 = arith.constant 2 : i32
    %120 = arith.muli %c6_i32, %c2_i32_51 : i32
    %121 = arith.index_cast %120 : i32 to index
    %c0_52 = arith.constant 0 : index
    %122 = vector.load %arg10[%121, %c0_52] : memref<16x32xf32, #tpu.memory_space<vmem>>, vector<2x32xf32>
    tpu.vector_store %arg10[%121, %c0_52], %119 {strides = array<i32>} : memref<16x32xf32, #tpu.memory_space<vmem>>, vector<2x32xf32>,
    %c7_i32 = arith.constant 7 : i32
    %123 = arith.index_cast %c7_i32 : i32 to index
    %c0_53 = arith.constant 0 : index
    %124 = memref.load %arg1[%123, %c0_53] : memref<8x2xi32, #tpu.memory_space<smem>>
    %125 = arith.index_cast %124 : i32 to index
    %c0_54 = arith.constant 0 : index
    %126 = vector.load %arg3[%125, %c0_54] : memref<32x32xf32, #tpu.memory_space<vmem>>, vector<1x32xf32>
    %127 = arith.index_cast %c7_i32 : i32 to index
    %c1_55 = arith.constant 1 : index
    %128 = memref.load %arg1[%127, %c1_55] : memref<8x2xi32, #tpu.memory_space<smem>>
    %129 = arith.index_cast %128 : i32 to index
    %c0_56 = arith.constant 0 : index
    %130 = vector.load %arg3[%129, %c0_56] : memref<32x32xf32, #tpu.memory_space<vmem>>, vector<1x32xf32>
    %131 = tpu.concatenate %126, %130 in 0 : vector<1x32xf32>, vector<1x32xf32> -> vector<2x32xf32>
    %cst_57 = arith.constant dense<0.000000e+00> : vector<2x32xf32>
    %132 = tpu.matmul %119, %0, %cst_57 {dimension_numbers = #tpu.dot_dimension_numbers<[1], [0], [0], [1], [0, 0, 1, 1], [], []>} : vector<2x32xf32>, vector<32x32xf32>, vector<2x32xf32> -> vector<2x32xf32>
    %133 = arith.addf %131, %132 : vector<2x32xf32>
    %134 = vector.broadcast %1 : vector<1x32xf32> to vector<2x32xf32>
    %135 = arith.addf %133, %134 : vector<2x32xf32>
    %136 = math.tanh %135 : vector<2x32xf32>
    %c2_i32_58 = arith.constant 2 : i32
    %137 = arith.muli %c7_i32, %c2_i32_58 : i32
    %138 = arith.index_cast %137 : i32 to index
    %c0_59 = arith.constant 0 : index
    %139 = vector.load %arg10[%138, %c0_59] : memref<16x32xf32, #tpu.memory_space<vmem>>, vector<2x32xf32>
    tpu.vector_store %arg10[%138, %c0_59], %136 {strides = array<i32>} : memref<16x32xf32, #tpu.memory_space<vmem>>, vector<2x32xf32>,
    %c8_i32 = arith.constant 8 : i32
    %c0_60 = arith.constant 0 : index
    %c0_61 = arith.constant 0 : index
    %c0_62 = arith.constant 0 : index
    %140 = vector.load %arg9[%c0_60, %c0_61, %c0_62] : memref<1x2x32xf32, #tpu.memory_space<vmem>>, vector<1x2x32xf32>
    %141 = vector.shape_cast %140 : vector<1x2x32xf32> to vector<2x32xf32>
    %142 = vector.shape_cast %136 : vector<2x32xf32> to vector<1x2x32xf32>
    tpu.vector_store %arg9[%c0_60, %c0_61, %c0_62], %142 {strides = array<i32>} : memref<1x2x32xf32, #tpu.memory_space<vmem>>, vector<1x2x32xf32>,
    %c0_63 = arith.constant 0 : index
    %c0_64 = arith.constant 0 : index
    %143 = vector.load %arg10[%c0_63, %c0_64] : memref<16x32xf32, #tpu.memory_space<vmem>>, vector<16x32xf32>
    %c0_65 = arith.constant 0 : index
    %c0_66 = arith.constant 0 : index
    %144 = vector.load %arg6[%c0_65, %c0_66] : memref<32x32xf32, #tpu.memory_space<vmem>>, vector<32x32xf32>
    %cst_67 = arith.constant dense<0.000000e+00> : vector<16x32xf32>
    %145 = tpu.matmul %143, %144, %cst_67 {dimension_numbers = #tpu.dot_dimension_numbers<[1], [0], [0], [1], [0, 0, 1, 1], [], []>} : vector<16x32xf32>, vector<32x32xf32>, vector<16x32xf32> -> vector<16x32xf32>
    %c0_68 = arith.constant 0 : index
    %c0_69 = arith.constant 0 : index
    %146 = vector.load %arg7[%c0_68, %c0_69] : memref<1x32xf32, #tpu.memory_space<vmem>>, vector<1x32xf32>
    %147 = vector.broadcast %146 : vector<1x32xf32> to vector<16x32xf32>
    %148 = arith.addf %145, %147 : vector<16x32xf32>
    %c0_70 = arith.constant 0 : index
    %c0_71 = arith.constant 0 : index
    %149 = vector.load %arg8[%c0_70, %c0_71] : memref<16x32xf32, #tpu.memory_space<vmem>>, vector<16x32xf32>
    tpu.vector_store %arg8[%c0_70, %c0_71], %148 {strides = array<i32>} : memref<16x32xf32, #tpu.memory_space<vmem>>, vector<16x32xf32>,
    return
  }
  func.func @transform_0(%arg0: i32, %arg1: memref<8x2xi32, #tpu.memory_space<smem>>) -> (i32, i32, i32) {
    %c0_i32 = arith.constant 0 : i32
    %c0_i32_0 = arith.constant 0 : i32
    %c0_i32_1 = arith.constant 0 : i32
    %c0_i32_2 = arith.constant 0 : i32
    return %c0_i32, %c0_i32_0, %c0_i32_1 : i32, i32, i32
  }
  func.func @transform_1(%arg0: i32, %arg1: memref<8x2xi32, #tpu.memory_space<smem>>) -> (i32, i32) {
    %c0_i32 = arith.constant 0 : i32
    %c0_i32_0 = arith.constant 0 : i32
    %c0_i32_1 = arith.constant 0 : i32
    return %c0_i32, %c0_i32_0 : i32, i32
  }
  func.func @transform_2(%arg0: i32, %arg1: memref<8x2xi32, #tpu.memory_space<smem>>) -> (i32, i32) {
    %c0_i32 = arith.constant 0 : i32
    %c0_i32_0 = arith.constant 0 : i32
    %c0_i32_1 = arith.constant 0 : i32
    return %c0_i32, %c0_i32_0 : i32, i32
  }
  func.func @transform_3(%arg0: i32, %arg1: memref<8x2xi32, #tpu.memory_space<smem>>) -> (i32, i32) {
    %c0_i32 = arith.constant 0 : i32
    %c0_i32_0 = arith.constant 0 : i32
    %c0_i32_1 = arith.constant 0 : i32
    return %c0_i32, %c0_i32_0 : i32, i32
  }
  func.func @transform_4(%arg0: i32, %arg1: memref<8x2xi32, #tpu.memory_space<smem>>) -> (i32, i32) {
    %c0_i32 = arith.constant 0 : i32
    %c0_i32_0 = arith.constant 0 : i32
    %c0_i32_1 = arith.constant 0 : i32
    return %c0_i32, %c0_i32_0 : i32, i32
  }
  func.func @transform_5(%arg0: i32, %arg1: memref<8x2xi32, #tpu.memory_space<smem>>) -> (i32, i32) {
    %c0_i32 = arith.constant 0 : i32
    %c0_i32_0 = arith.constant 0 : i32
    %c0_i32_1 = arith.constant 0 : i32
    return %c0_i32, %c0_i32_0 : i32, i32
  }
  func.func @transform_6(%arg0: i32, %arg1: memref<8x2xi32, #tpu.memory_space<smem>>) -> (i32, i32) {
    %c0_i32 = arith.constant 0 : i32
    %c0_i32_0 = arith.constant 0 : i32
    %c0_i32_1 = arith.constant 0 : i32
    return %c0_i32, %c0_i32_0 : i32, i32
  }
  func.func @transform_7(%arg0: i32, %arg1: memref<8x2xi32, #tpu.memory_space<smem>>) -> (i32, i32, i32) {
    %c0_i32 = arith.constant 0 : i32
    %c0_i32_0 = arith.constant 0 : i32
    %c0_i32_1 = arith.constant 0 : i32
    %c0_i32_2 = arith.constant 0 : i32
    return %c0_i32, %c0_i32_0, %c0_i32_1 : i32, i32, i32
  }
}

</mosaic_0001>

<bundles_post_ra>
// kernel: tpu_custom_call.1
= control target key start
LH: loop header
LB: loop body
LE: loop exit
PB: predicated region body
PF: predicated region fallthrough
CT: control target
= control target key end

     0   :  { %s678_s30 = smov [#allocation4]   ;;  %s813_s0 = inlined_call_operand.vmem [shape: s32[8,2], index: 0, kind: input, shape index: {}]   ;;  %s814_s1 = inlined_call_operand.vmem [shape: f32[1,2,32], index: 1, kind: input, shape index: {}]   ;;  %s815_s2 = inlined_call_operand.hbm [shape: f32[32,32], index: 2, kind: input, shape index: {}]   ;;  %s816_s3 = inlined_call_operand.hbm [shape: f32[32,32], index: 3, kind: input, shape index: {}]   ;;  %s817_s4 = inlined_call_operand.vmem [shape: f32[1,32], index: 4, kind: input, shape index: {}]   ;;  %s818_s5 = inlined_call_operand.hbm [shape: f32[32,32], index: 5, kind: input, shape index: {}]   ;;  %s819_s6 = inlined_call_operand.vmem [shape: f32[1,32], index: 6, kind: input, shape index: {}]   ;;  %s820_s7 = inlined_call_operand.hbm [shape: f32[16,32], index: 7, kind: output, shape index: {0}]   ;;  %s821_s8 = inlined_call_operand.hbm [shape: f32[1,2,32], index: 8, kind: output, shape index: {1}]  }
   0x1   :  { %s15_s29 = sshll.u32 %s813_s0, 4  ;;  %s16_s29 = int_to_ptr.vmem [resolvable:$true] %s15_s29 }
   0x2   :  { %18 = dma.vmem_to_smem %s16_s29, 128, %s678_s30, [#allocation3] }
   0x3   :  { %668 = dma.done.wait [#allocation3], 128 }
   0x4   :  { %669 = vsyncadd [#allocation3], 4294967168 }
   0x5   :  { %21 = sfence }
   0x6   :  { %22 = vsyncpa [#allocation6], 0 }
   0x7   :  { %23 = vsyncpa [#allocation9], 0 }
   0x8   :  { %24 = vsyncpa [#allocation7], 0 }
   0x9   :  { %25 = vsyncpa [#allocation13], 0  ;;  %s45_s11 = sshll.u32 %s816_s3, 4  ;;  %s679_s12 = smov [#allocation8]   ;;  %s46_s11 = int_to_ptr.hbm [resolvable:$true] %s45_s11 }
   0xa   :  { %s47_s13 = sshll.u32 %s679_s12, 4  ;;  %s32_s15 = sshll.u32 %s815_s2, 4  ;;  %s48_s13 = int_to_ptr.vmem [resolvable:$true] %s47_s13  ;;  %s33_s15 = int_to_ptr.hbm [resolvable:$true] %s32_s15 }
   0xb   :  { %s680_s16 = smov 128   ;;  %s681_s17 = smov 8  }
   0xc   :  { %53 = dma.hbm_to_vmem [thread:$0]  %s46_s11, 512, %s48_s13, [#allocation9], %s680_s16, %s680_s16, %s681_s17  }
   0xd   :  { %s682_s18 = smov [#allocation5]   ;;  %s60_s3 = sshll.u32 %s818_s5, 4  ;;  %s61_s3 = int_to_ptr.hbm [resolvable:$true] %s60_s3 }
   0xe   :  { %s34_s19 = sshll.u32 %s682_s18, 4  ;;  %s683_s2 = smov [#allocation10]   ;;  %s35_s19 = int_to_ptr.vmem [resolvable:$true] %s34_s19 }
   0xf   :  { %40 = dma.hbm_to_vmem [thread:$0]  %s33_s15, 512, %s35_s19, [#allocation6], %s680_s16, %s680_s16, %s681_s17  }
  0x10   :  { %s62_s22 = sshll.u32 %s683_s2, 4  ;;  %s63_s22 = int_to_ptr.vmem [resolvable:$true] %s62_s22 }
  0x11   :  { %68 = dma.hbm_to_vmem [thread:$0]  %s61_s3, 512, %s63_s22, [#allocation9], %s680_s16, %s680_s16, %s681_s17  }
  0x12   :  { %670 = dma.done.wait [#allocation6], 512  }
  0x13   :  { %671 = vsyncadd [#allocation6], 4294966784 }
  0x14   :  { %672 = dma.done.wait [#allocation9], 1024  }
  0x15   :  { %673 = vsyncadd [#allocation9], 4294966272  ;;  %v86_v0 = vld [vmem:[#allocation8 + $0x18] sm:$0xff]  ;;  %v85_v1 = vld [vmem:[#allocation8 + $0x10] sm:$0xff]  ;;  %vm100_vm0 = vcmask 261120   ;;  %s89_s24 = sld [smem:[#allocation4]] }
  0x16   :  { %116 = vmatpush.msra.mxu1 %v86_v0  ;;  %194 = vmatpush.msra.mxu2 %v86_v0  ;;  %v84_v2 = vld [vmem:[#allocation8 + $0x8] sm:$0xff]  ;;  %v83_v3 = vld [vmem:[#allocation8] sm:$0xff]  ;;  %v88_v4 = vld [vmem:[%s814_s1] sm:$0x3]  ;;  %s485_s1 = sld [smem:[#allocation4 + $0x1]]  ;;  %vm98_vm1 = vcmask 1040384  }
  0x17   :  { %231 = vmatpush.msra.mxu3 %v86_v0  ;;  %268 = vmatpush.msra.mxu0 %v86_v0  ;;  %v760_v9 = vld [vmem:[%s817_s4] ss:$0 sm:$0xff]  ;;  %vm130_vm2 = vcmask 254976   ;;  %s488_s29 = sld [smem:[#allocation4 + $0x81]]  ;;  %v397_v30 = vld [vmem:[#allocation10 + $0x18] sm:$0xff]  ;;  %v395_v32 = vld [vmem:[#allocation10 + $0x8] sm:$0xff] }
  0x18   :  { %117 = vmatpush.msra.mxu1 %v85_v1  ;;  %195 = vmatpush.msra.mxu2 %v85_v1  ;;  %s487_s30 = sld [smem:[#allocation4 + $0x80]]  ;;  %v396_v31 = vld [vmem:[#allocation10 + $0x10] sm:$0xff]  ;;  %v394_v33 = vld [vmem:[#allocation10] sm:$0xff] }
  0x19   :  { %232 = vmatpush.msra.mxu3 %v85_v1  ;;  %269 = vmatpush.msra.mxu0 %v85_v1  ;;  %s491_s4 = sld [smem:[#allocation4 + $0x101]]  ;;  %v783_v50 = vld [vmem:[%s819_s6] ss:$0 sm:$0xff] }
  0x1a   :  { %118 = vmatpush.msra.mxu1 %v84_v2  ;;  %196 = vmatpush.msra.mxu2 %v84_v2  ;;  %s490_s11 = sld [smem:[#allocation4 + $0x100]] }
  0x1b   :  { %233 = vmatpush.msra.mxu3 %v84_v2  ;;  %270 = vmatpush.msra.mxu0 %v84_v2  ;;  %s90_s26 = scalar_lea.vmem [#allocation5], %s89_s24  ;;  %s494_s14 = sld [smem:[#allocation4 + $0x181]] }
  0x1c   :  { %119 = vmatpush.msra.mxu1 %v83_v3  ;;  %197 = vmatpush.msra.mxu2 %v83_v3  ;;  %s93_s25 = scalar_lea.vmem [#allocation5], %s485_s1  ;;  %v91_v7 = vld [vmem:[%s90_s26] sm:$0x1]  ;;  %s493_s0 = sld [smem:[#allocation4 + $0x180]] }
  0x1d   :  { %486 = vmatmul.msk.f32.vlgmr.msra.gmra.mxu1 %vm100_vm0, %v88_v4  ;;  %234 = vmatpush.msra.mxu3 %v83_v3  ;;  %v94_v5 = vld [vmem:[%s93_s25] sm:$0x1]  ;;  %s136_s9 = scalar_lea.vmem [#allocation5], %s488_s29  ;;  %s497_s19 = sld [smem:[#allocation4 + $0x201]] }
  0x1e   :  { %157 = vmatpush.msrb.mxu1 %v86_v0  ;;  %271 = vmatpush.msra.mxu0 %v83_v3  ;;  %v96_v6 = vrot.slane %v94_v5, 7  ;;  %v137_v14 = vld [vmem:[%s136_s9] sm:$0x1]  ;;  %s133_s10 = scalar_lea.vmem [#allocation5], %s487_s30  ;;  %s496_s20 = sld [smem:[#allocation4 + $0x200]] }
  0x1f   :  { %342 = vmatpush.msrb.mxu2 %v86_v0  ;;  %379 = vmatpush.msrb.mxu3 %v86_v0  ;;  %v139_v15 = vrot.slane %v137_v14, 7  ;;  %v134_v16 = vld [vmem:[%s133_s10] sm:$0x1]  ;;  %s173_s12 = scalar_lea.vmem [#allocation5], %s491_s4  ;;  %s500_s5 = sld [smem:[#allocation4 + $0x281]] }
  0x20   :  { %158 = vmatpush.msrb.mxu1 %v85_v1  ;;  %v99_v8 = vsel %vm98_vm1, %v91_v7, %v96_v6  ;;  %v174_v22 = vld [vmem:[%s173_s12] sm:$0x1]  ;;  %s170_s13 = scalar_lea.vmem [#allocation5], %s490_s11  ;;  %420 = vmatpush.msrb.mxu0 %v397_v30  ;;  %s499_s23 = sld [smem:[#allocation4 + $0x280]] }
  0x21   :  { %343 = vmatpush.msrb.mxu2 %v85_v1  ;;  %380 = vmatpush.msrb.mxu3 %v85_v1  ;;  %v141_v17 = vsel %vm98_vm1, %v134_v16, %v139_v15  ;;  %v176_v23 = vrot.slane %v174_v22, 7  ;;  %v171_v24 = vld [vmem:[%s170_s13] sm:$0x1]  ;;  %s210_s15 = scalar_lea.vmem [#allocation5], %s494_s14  ;;  %s503_s6 = sld [smem:[#allocation4 + $0x301]] }
  0x22   :  { %159 = vmatpush.msrb.mxu1 %v84_v2  ;;  %421 = vmatpush.msrb.mxu0 %v396_v31  ;;  %v211_v34 = vld [vmem:[%s210_s15] sm:$0x1]  ;;  %s207_s18 = scalar_lea.vmem [#allocation5], %s493_s0  ;;  %s502_s25 = sld [smem:[#allocation4 + $0x300]] }
  0x23   :  { %344 = vmatpush.msrb.mxu2 %v84_v2  ;;  %381 = vmatpush.msrb.mxu3 %v84_v2  ;;  %v178_v25 = vsel %vm98_vm1, %v171_v24, %v176_v23  ;;  %v213_v35 = vrot.slane %v211_v34, 7  ;;  %v208_v36 = vld [vmem:[%s207_s18] sm:$0x1]  ;;  %s247_s21 = scalar_lea.vmem [#allocation5], %s497_s19  ;;  %s506_s28 = sld [smem:[#allocation4 + $0x381]] }
  0x24   :  { %160 = vmatpush.msrb.mxu1 %v83_v3  ;;  %422 = vmatpush.msrb.mxu0 %v395_v32  ;;  %v248_v43 = vld [vmem:[%s247_s21] sm:$0x1]  ;;  %s244_s3 = scalar_lea.vmem [#allocation5], %s496_s20  ;;  %s505_s29 = sld [smem:[#allocation4 + $0x380]] }
  0x25   :  { %345 = vmatpush.msrb.mxu2 %v83_v3  ;;  %382 = vmatpush.msrb.mxu3 %v83_v3  ;;  %v215_v37 = vsel %vm98_vm1, %v208_v36, %v213_v35  ;;  %v250_v44 = vrot.slane %v248_v43, 7  ;;  %v245_v45 = vld [vmem:[%s244_s3] sm:$0x1]  ;;  %s284_s1 = scalar_lea.vmem [#allocation5], %s500_s5  ;;  %s684_s10 = smov [#allocation12]  }
  0x26   :  { %305 = vmatpush.msra.mxu1 %v86_v0  ;;  %423 = vmatpush.msrb.mxu0 %v394_v33  ;;  %v285_v54 = vld [vmem:[%s284_s1] sm:$0x1]  ;;  %s281_s24 = scalar_lea.vmem [#allocation5], %s499_s23  ;;  %s451_s4 = sshll.u32 %s684_s10, 4  ;;  %s452_s4 = int_to_ptr.vmem [resolvable:$true] %s451_s4 }
  0x27   :  { %v252_v46 = vsel %vm98_vm1, %v245_v45, %v250_v44  ;;  %v287_v55 = vrot.slane %v285_v54, 7  ;;  %v282_v56 = vld [vmem:[%s281_s24] sm:$0x1]  ;;  %s321_s26 = scalar_lea.vmem [#allocation5], %s503_s6  ;;  %s453_s13 = sshll.u32 %s821_s8, 4  ;;  %s454_s13 = int_to_ptr.hbm [resolvable:$true] %s453_s13 }
  0x28   :  { %306 = vmatpush.msra.mxu1 %v85_v1  ;;  %v322_v62 = vld [vmem:[%s321_s26] sm:$0x1]  ;;  %s318_s27 = scalar_lea.vmem [#allocation5], %s502_s25  ;;  %s685_s14 = smov [#allocation11]  }
  0x29   :  { %v289_v57 = vsel %vm98_vm1, %v282_v56, %v287_v55  ;;  %v324_v63 = vrot.slane %v322_v62, 7  ;;  %v319_v0 = vld [vmem:[%s318_s27] sm:$0x1]  ;;  %s358_s30 = scalar_lea.vmem [#allocation5], %s506_s28  ;;  %s437_s0 = sshll.u32 %s685_s14, 4  ;;  %s438_s0 = int_to_ptr.vmem [resolvable:$true] %s437_s0 }
  0x2a   :  { %307 = vmatpush.msra.mxu1 %v84_v2  ;;  %v359_v6 = vld [vmem:[%s358_s30] sm:$0x1]  ;;  %s355_s9 = scalar_lea.vmem [#allocation5], %s505_s29  ;;  %s439_s19 = sshll.u32 %s820_s7, 4  ;;  %s440_s19 = int_to_ptr.hbm [resolvable:$true] %s439_s19 }
  0x2b   :  { %v326_v1 = vsel %vm98_vm1, %v319_v0, %v324_v63  ;;  %v361_v7 = vrot.slane %v359_v6, 7 }
  0x2c   :  { %308 = vmatpush.msra.mxu1 %v83_v3 }
  0x9a   :  { %v121_v10 = vpop.f32.mrf.mxu1 }
  0x9b   :  { %v124_v11 = vadd.f32 %v121_v10, %v99_v8  ;;  %v356_v8 = vld [vmem:[%s355_s9] sm:$0x1] }
  0x9c   :  { %v363_v10 = vsel %vm98_vm1, %v356_v8, %v361_v7 }
  0x9d   :  { %v128_v12 = vadd.f32 %v760_v9, %v124_v11 }
  0x9f   :  { %520 = vtanh.f32 %v128_v12 }
  0xa5   :  { %v521_v13 = vpop.eup %520 }
  0xa6   :  { %131 = vst.msk [vmem:[#allocation2] sm:$0x3] %vm130_vm2, %v521_v13  ;;  %489 = vmatmul.msk.f32.vlgmr.msrb.gmra.mxu1 %vm100_vm0, %v521_v13 }
 0x123   :  { %v162_v18 = vpop.f32.mrf.mxu1 }
 0x124   :  { %v165_v19 = vadd.f32 %v162_v18, %v141_v17 }
 0x126   :  { %v166_v20 = vadd.f32 %v760_v9, %v165_v19 }
 0x128   :  { %522 = vtanh.f32 %v166_v20 }
 0x12e   :  { %v523_v21 = vpop.eup %522 }
 0x12f   :  { %168 = vst.msk [vmem:[#allocation2 + $0x2] sm:$0x3] %vm130_vm2, %v523_v21  ;;  %492 = vmatmul.msk.f32.vlgmr.msra.gmra.mxu2 %vm100_vm0, %v523_v21 }
 0x1b2   :  { %v199_v26 = vpop.f32.mrf.mxu2 }
 0x1b3   :  { %v202_v27 = vadd.f32 %v199_v26, %v178_v25 }
 0x1b5   :  { %v203_v28 = vadd.f32 %v760_v9, %v202_v27 }
 0x1b7   :  { %524 = vtanh.f32 %v203_v28 }
 0x1bd   :  { %v525_v29 = vpop.eup %524 }
 0x1be   :  { %205 = vst.msk [vmem:[#allocation2 + $0x4] sm:$0x3] %vm130_vm2, %v525_v29  ;;  %495 = vmatmul.msk.f32.vlgmr.msra.gmra.mxu3 %vm100_vm0, %v525_v29 }
 0x241   :  { %v236_v38 = vpop.f32.mrf.mxu3 }
 0x242   :  { %v239_v39 = vadd.f32 %v236_v38, %v215_v37 }
 0x244   :  { %v240_v40 = vadd.f32 %v760_v9, %v239_v39 }
 0x246   :  { %526 = vtanh.f32 %v240_v40 }
 0x24c   :  { %v527_v41 = vpop.eup %526 }
 0x24d   :  { %242 = vst.msk [vmem:[#allocation2 + $0x6] sm:$0x3] %vm130_vm2, %v527_v41  ;;  %498 = vmatmul.msk.f32.vlgmr.msra.gmra.mxu0 %vm100_vm0, %v527_v41 }
 0x254   :  { %v392_v42 = vld [vmem:[#allocation2] sm:$0xff] }
 0x255   :  { %508 = vmatmul.msk.f32.vlgmr.msrb.gmra.mxu0 %vm100_vm0, %v392_v42 }
 0x2ca   :  { %v273_v47 = vpop.f32.mrf.mxu0 }
 0x2cb   :  { %v276_v48 = vadd.f32 %v273_v47, %v252_v46 }
 0x2cd   :  { %v277_v49 = vadd.f32 %v760_v9, %v276_v48 }
 0x2cf   :  { %528 = vtanh.f32 %v277_v49 }
 0x2d2   :  { %v425_v51 = vpop.f32.mrf.mxu0 }
 0x2d3   :  { %v426_v52 = vadd.f32 %v783_v50, %v425_v51 }
 0x2d5   :  { %v529_v53 = vpop.eup %528  ;;  %431 = vst.msk [vmem:[#allocation11] sm:$0xff] %vm100_vm0, %v426_v52 }
 0x2d6   :  { %279 = vst.msk [vmem:[#allocation2 + $0x8] sm:$0x3] %vm130_vm2, %v529_v53  ;;  %501 = vmatmul.msk.f32.vlgmr.msra.gmra.mxu1 %vm100_vm0, %v529_v53 }
 0x353   :  { %v310_v58 = vpop.f32.mrf.mxu1 }
 0x354   :  { %v313_v59 = vadd.f32 %v310_v58, %v289_v57 }
 0x356   :  { %v314_v60 = vadd.f32 %v760_v9, %v313_v59 }
 0x358   :  { %530 = vtanh.f32 %v314_v60 }
 0x35e   :  { %v531_v61 = vpop.eup %530 }
 0x35f   :  { %316 = vst.msk [vmem:[#allocation2 + $0xa] sm:$0x3] %vm130_vm2, %v531_v61  ;;  %504 = vmatmul.msk.f32.vlgmr.msrb.gmra.mxu2 %vm100_vm0, %v531_v61 }
 0x3e2   :  { %v347_v2 = vpop.f32.mrf.mxu2 }
 0x3e3   :  { %v350_v3 = vadd.f32 %v347_v2, %v326_v1 }
 0x3e5   :  { %v351_v4 = vadd.f32 %v760_v9, %v350_v3 }
 0x3e7   :  { %532 = vtanh.f32 %v351_v4 }
 0x3ed   :  { %v533_v5 = vpop.eup %532 }
 0x3ee   :  { %353 = vst.msk [vmem:[#allocation2 + $0xc] sm:$0x3] %vm130_vm2, %v533_v5  ;;  %507 = vmatmul.msk.f32.vlgmr.msrb.gmra.mxu3 %vm100_vm0, %v533_v5 }
 0x471   :  { %v384_v11 = vpop.f32.mrf.mxu3 }
 0x472   :  { %v387_v12 = vadd.f32 %v384_v11, %v363_v10 }
 0x474   :  { %v388_v13 = vadd.f32 %v760_v9, %v387_v12 }
 0x476   :  { %534 = vtanh.f32 %v388_v13 }
 0x47c   :  { %v535_v14 = vpop.eup %534 }
 0x47d   :  { %390 = vst.msk [vmem:[#allocation2 + $0xe] sm:$0x3] %vm130_vm2, %v535_v14 }
 0x47e   :  { %391 = vst.msk [vmem:[#allocation12] sm:$0x3] %vm130_vm2, %v535_v14 }
 0x47f   :  { %456 = dma.vmem_to_hbm [thread:$0]  %s452_s4, 32, %s454_s13, [#allocation13]  }
 0x484   :  { %v393_v15 = vld [vmem:[#allocation2 + $0x8] sm:$0xff] }
 0x485   :  { %509 = vmatmul.msk.f32.gmra.mxu0 %vm100_vm0, %v393_v15 }
 0x502   :  { %v428_v9 = vpop.f32.mrf.mxu0 }
 0x503   :  { %v429_v16 = vadd.f32 %v783_v50, %v428_v9 }
 0x505   :  { %432 = vst.msk [vmem:[#allocation11 + $0x8] sm:$0xff] %vm100_vm0, %v429_v16 }
 0x506   :  { %445 = dma.vmem_to_hbm [thread:$0]  %s438_s0, 256, %s440_s19, [#allocation7], %s680_s16, %s680_s16, %s681_s17  }
 0x507   :  { %674 = dma.done.wait [#allocation7], 256  }
 0x508   :  { %675 = vsyncadd [#allocation7], 4294967040 }
 0x509   :  { %676 = dma.done.wait [#allocation13], 32  }
 0x50a   :  { %677 = vsyncadd [#allocation13], 4294967264 }
 0x50b   :  { %465 = vsyncpa [#allocation6], 1 }
 0x50c   :  { %466 = vsyncpa [#allocation9], 1 }
 0x50d   :  { %467 = vsyncpa [#allocation7], 1 }
 0x50e   :  { %468 = vsyncpa [#allocation13], 1 }

</bundles_post_ra>
